<compile_context>
chip_gen: v7x
topology: tpu7x:2x2x1
jax: 0.10.0
libtpu: 0.0.40
codegen_flags: <defaults>
</compile_context>

<pallas_src>
import math
from functools import partial

import jax
import jax.numpy as jnp
from jax.experimental import pallas as pl
from jax.experimental.pallas import tpu as pltpu


def _round_up(n, m):
    return ((n + m - 1) // m) * m


def _sigmoid(x):
    # logistic(x) == 0.5 * tanh(0.5 * x) + 0.5 : tanh goes to the EUP slot, no f32 divide on VALU.
    return 0.5 * jnp.tanh(0.5 * x) + 0.5


def _make_mlp_kernel(layer_dims):
    l1, l2, l3, l4 = layer_dims

    def kernel(x_ref, w1_ref, w2_ref, w3_ref, w4_ref, b_ref, o_ref):
        wdt = w1_ref.dtype                      # compute/streaming dtype (f32 or bf16)
        b = b_ref[...]                          # (4, max_out) packed f32 biases

        # Layer 1: (TILE_B, 300) @ (300, l1) -> f32 accumulate, bias + sigmoid in f32.
        h = _sigmoid(jnp.dot(x_ref[...], w1_ref[...],
                             preferred_element_type=jnp.float32) + b[0:1, :l1])
        # Layer 2
        h = _sigmoid(jnp.dot(h.astype(wdt), w2_ref[...],
                             preferred_element_type=jnp.float32) + b[1:2, :l2])
        # Layer 3
        h = _sigmoid(jnp.dot(h.astype(wdt), w3_ref[...],
                             preferred_element_type=jnp.float32) + b[2:3, :l3])
        # Output layer
        out = _sigmoid(jnp.dot(h.astype(wdt), w4_ref[...],
                               preferred_element_type=jnp.float32) + b[3:4, :l4])

        # Output last dim = 1 -> masked partial store; tiny byte count, accepted cost.
        o_ref[...] = out.astype(o_ref.dtype)

    return kernel


def mlp_forward(x, params, *, tile_b=512, compute_dtype=jnp.float32):
    """Forward pass of the 300->20->10->4->1 sigmoid MLP as a single Pallas kernel,
    tiled over the batch dimension."""
    (w1, b1), (w2, b2), (w3, b3), (w4, b4) = params
    batch, in_dim = x.shape
    layer_dims = (w1.shape[1], w2.shape[1], w3.shape[1], w4.shape[1])
    out_dim = layer_dims[-1]

    # Pack the four biases into one (4, max_out) f32 operand (one DMA / one padded VMEM tile).
    max_out = max(layer_dims)
    b_packed = jnp.concatenate(
        [jnp.pad(b.astype(jnp.float32), ((0, 0), (0, max_out - b.shape[1])))
         for b in (b1, b2, b3, b4)],
        axis=0,
    )

    # Batch tile: multiple of the sublane quantum for the streaming dtype, capped by the batch.
    sub = 8 if jnp.dtype(compute_dtype).itemsize >= 4 else 16
    tb = max(sub, min(int(tile_b), _round_up(batch, sub)))
    tb = _round_up(tb, sub)
    padded_batch = _round_up(batch, tb)
    if padded_batch != batch:
        x = jnp.pad(x, ((0, padded_batch - batch), (0, 0)))

    # Stream x / weights in the compute dtype (bf16 halves HBM traffic on v6e/v7x);
    # accumulation stays f32 via preferred_element_type in the kernel.
    x = x.astype(compute_dtype)
    ws = tuple(w.astype(compute_dtype) for w in (w1, w2, w3, w4))

    grid = (padded_batch // tb,)
    resident = lambda a: pl.BlockSpec(a.shape, lambda i: (0, 0))  # stays in VMEM across steps

    out = pl.pallas_call(
        _make_mlp_kernel(layer_dims),
        out_shape=jax.ShapeDtypeStruct((padded_batch, out_dim), jnp.float32),
        grid=grid,
        in_specs=[pl.BlockSpec((tb, in_dim), lambda i: (i, 0))]      # x: tiled over rows
                 + [resident(w) for w in ws]                          # weights: full, resident
                 + [resident(b_packed)],                              # packed biases: resident
        out_specs=pl.BlockSpec((tb, out_dim), lambda i: (i, 0)),
        compiler_params=pltpu.CompilerParams(
            dimension_semantics=("parallel",)),                       # megacore sharding on v7x
    )(x, *ws, b_packed)

    return out[:batch]


def init_params(key, input_nodes=300, layer1=20, layer2=10, layer3=4, out=1):
    """Mirrors the PyTorch module: weights ~ N(0, 0.01), biases ~ U(-1/sqrt(fan_in), 1/sqrt(fan_in))
    (nn.Linear default bias init). Weights stored (in_features, out_features)."""
    dims = [(input_nodes, layer1), (layer1, layer2), (layer2, layer3), (layer3, out)]
    params = []
    for fan_in, fan_out in dims:
        key, kw, kb = jax.random.split(key, 3)
        w = 0.01 * jax.random.normal(kw, (fan_in, fan_out), dtype=jnp.float32)
        bound = 1.0 / math.sqrt(fan_in)
        b = jax.random.uniform(kb, (1, fan_out), dtype=jnp.float32,
                               minval=-bound, maxval=bound)
        params.append((w, b))
    return params


def reference_forward(x, params):
    h = x
    for (w, b) in params:
        h = jax.nn.sigmoid(h @ w + b)
    return h


if __name__ == "__main__":
    key = jax.random.PRNGKey(0)
    key, kx = jax.random.split(key)

    batch, input_nodes = 8, 300
    x = jax.random.normal(kx, (batch, input_nodes), dtype=jnp.float32)
    params = init_params(key, input_nodes=input_nodes)

    # 1) Small batch, f32 path (single grid step), tight check vs. JAX reference.
    y = mlp_forward(x, params, compute_dtype=jnp.float32)
    jax.block_until_ready(y)
    y_ref = reference_forward(x, params)
    assert y.shape == (batch, 1)
    assert jnp.allclose(y, y_ref, atol=1e-5, rtol=1e-5), "f32 mismatch vs JAX reference"

    # 2) Larger batch exercising the batch grid (multiple tiles + row padding) with bf16 streaming.
    key, kx2 = jax.random.split(key)
    big_batch = 1000
    xb = jax.random.normal(kx2, (big_batch, input_nodes), dtype=jnp.float32)
    yb = mlp_forward(xb, params, tile_b=256, compute_dtype=jnp.bfloat16)
    jax.block_until_ready(yb)
    yb_ref = reference_forward(xb, params)
    assert yb.shape == (big_batch, 1)
    assert jnp.allclose(yb, yb_ref, atol=2e-2, rtol=2e-2), "bf16 mismatch vs JAX reference"

    print("KERNEL_OK")
</pallas_src>

<mosaic_0001>
module attributes {stable_mosaic.version = 11 : i64} {
  func.func @kernel(%arg0: i32, %arg1: memref<8x300xf32, #tpu.memory_space<vmem>>, %arg2: memref<300x20xf32, #tpu.memory_space<vmem>>, %arg3: memref<20x10xf32, #tpu.memory_space<vmem>>, %arg4: memref<10x4xf32, #tpu.memory_space<vmem>>, %arg5: memref<4x1xf32, #tpu.memory_space<vmem>>, %arg6: memref<4x20xf32, #tpu.memory_space<vmem>>, %arg7: memref<8x1xf32, #tpu.memory_space<vmem>>) attributes {dimension_semantics = [#tpu.dimension_semantics<parallel>], iteration_bounds = array<i64: 1>, scalar_prefetch = 0 : i64, scratch_operands = 0 : i64, tpu.core_type = #tpu.core_type<tc>, window_params = [{transform_indices = @transform_0, window_bounds = array<i64: 8, 300>}, {pipeline_mode = #tpu.pipeline_mode<synchronous>, transform_indices = @transform_1, window_bounds = array<i64: 300, 20>}, {pipeline_mode = #tpu.pipeline_mode<synchronous>, transform_indices = @transform_2, window_bounds = array<i64: 20, 10>}, {pipeline_mode = #tpu.pipeline_mode<synchronous>, transform_indices = @transform_3, window_bounds = array<i64: 10, 4>}, {pipeline_mode = #tpu.pipeline_mode<synchronous>, transform_indices = @transform_4, window_bounds = array<i64: 4, 1>}, {pipeline_mode = #tpu.pipeline_mode<synchronous>, transform_indices = @transform_5, window_bounds = array<i64: 4, 20>}, {transform_indices = @transform_6, window_bounds = array<i64: 8, 1>}]} {
    %c0 = arith.constant 0 : index
    %c0_0 = arith.constant 0 : index
    %0 = vector.load %arg6[%c0, %c0_0] : memref<4x20xf32, #tpu.memory_space<vmem>>, vector<4x20xf32>
    %c0_1 = arith.constant 0 : index
    %c0_2 = arith.constant 0 : index
    %1 = vector.load %arg1[%c0_1, %c0_2] : memref<8x300xf32, #tpu.memory_space<vmem>>, vector<8x300xf32>
    %c0_3 = arith.constant 0 : index
    %c0_4 = arith.constant 0 : index
    %2 = vector.load %arg2[%c0_3, %c0_4] : memref<300x20xf32, #tpu.memory_space<vmem>>, vector<300x20xf32>
    %cst = arith.constant dense<0.000000e+00> : vector<8x20xf32>
    %3 = tpu.matmul %1, %2, %cst {dimension_numbers = #tpu.dot_dimension_numbers<[1], [0], [0], [1], [0, 0, 1, 1], [], []>} : vector<8x300xf32>, vector<300x20xf32>, vector<8x20xf32> -> vector<8x20xf32>
    %4 = vector.extract_strided_slice %0 {offsets = [0, 0], sizes = [1, 20], strides = [1, 1]} : vector<4x20xf32> to vector<1x20xf32>
    %5 = vector.broadcast %4 : vector<1x20xf32> to vector<8x20xf32>
    %6 = arith.addf %3, %5 : vector<8x20xf32>
    %cst_5 = arith.constant 5.000000e-01 : f32
    %7 = vector.broadcast %cst_5 : f32 to vector<8x20xf32>
    %8 = arith.mulf %7, %6 : vector<8x20xf32>
    %9 = math.tanh %8 : vector<8x20xf32>
    %cst_6 = arith.constant 5.000000e-01 : f32
    %10 = vector.broadcast %cst_6 : f32 to vector<8x20xf32>
    %11 = arith.mulf %10, %9 : vector<8x20xf32>
    %cst_7 = arith.constant 5.000000e-01 : f32
    %12 = vector.broadcast %cst_7 : f32 to vector<8x20xf32>
    %13 = arith.addf %11, %12 : vector<8x20xf32>
    %c0_8 = arith.constant 0 : index
    %c0_9 = arith.constant 0 : index
    %14 = vector.load %arg3[%c0_8, %c0_9] : memref<20x10xf32, #tpu.memory_space<vmem>>, vector<20x10xf32>
    %cst_10 = arith.constant dense<0.000000e+00> : vector<8x10xf32>
    %15 = tpu.matmul %13, %14, %cst_10 {dimension_numbers = #tpu.dot_dimension_numbers<[1], [0], [0], [1], [0, 0, 1, 1], [], []>} : vector<8x20xf32>, vector<20x10xf32>, vector<8x10xf32> -> vector<8x10xf32>
    %16 = vector.extract_strided_slice %0 {offsets = [1, 0], sizes = [1, 10], strides = [1, 1]} : vector<4x20xf32> to vector<1x10xf32>
    %17 = vector.broadcast %16 : vector<1x10xf32> to vector<8x10xf32>
    %18 = arith.addf %15, %17 : vector<8x10xf32>
    %cst_11 = arith.constant 5.000000e-01 : f32
    %19 = vector.broadcast %cst_11 : f32 to vector<8x10xf32>
    %20 = arith.mulf %19, %18 : vector<8x10xf32>
    %21 = math.tanh %20 : vector<8x10xf32>
    %cst_12 = arith.constant 5.000000e-01 : f32
    %22 = vector.broadcast %cst_12 : f32 to vector<8x10xf32>
    %23 = arith.mulf %22, %21 : vector<8x10xf32>
    %cst_13 = arith.constant 5.000000e-01 : f32
    %24 = vector.broadcast %cst_13 : f32 to vector<8x10xf32>
    %25 = arith.addf %23, %24 : vector<8x10xf32>
    %c0_14 = arith.constant 0 : index
    %c0_15 = arith.constant 0 : index
    %26 = vector.load %arg4[%c0_14, %c0_15] : memref<10x4xf32, #tpu.memory_space<vmem>>, vector<10x4xf32>
    %cst_16 = arith.constant dense<0.000000e+00> : vector<8x4xf32>
    %27 = tpu.matmul %25, %26, %cst_16 {dimension_numbers = #tpu.dot_dimension_numbers<[1], [0], [0], [1], [0, 0, 1, 1], [], []>} : vector<8x10xf32>, vector<10x4xf32>, vector<8x4xf32> -> vector<8x4xf32>
    %28 = vector.extract_strided_slice %0 {offsets = [2, 0], sizes = [1, 4], strides = [1, 1]} : vector<4x20xf32> to vector<1x4xf32>
    %29 = vector.broadcast %28 : vector<1x4xf32> to vector<8x4xf32>
    %30 = arith.addf %27, %29 : vector<8x4xf32>
    %cst_17 = arith.constant 5.000000e-01 : f32
    %31 = vector.broadcast %cst_17 : f32 to vector<8x4xf32>
    %32 = arith.mulf %31, %30 : vector<8x4xf32>
    %33 = math.tanh %32 : vector<8x4xf32>
    %cst_18 = arith.constant 5.000000e-01 : f32
    %34 = vector.broadcast %cst_18 : f32 to vector<8x4xf32>
    %35 = arith.mulf %34, %33 : vector<8x4xf32>
    %cst_19 = arith.constant 5.000000e-01 : f32
    %36 = vector.broadcast %cst_19 : f32 to vector<8x4xf32>
    %37 = arith.addf %35, %36 : vector<8x4xf32>
    %c0_20 = arith.constant 0 : index
    %c0_21 = arith.constant 0 : index
    %38 = vector.load %arg5[%c0_20, %c0_21] : memref<4x1xf32, #tpu.memory_space<vmem>>, vector<4x1xf32>
    %cst_22 = arith.constant dense<0.000000e+00> : vector<8x1xf32>
    %39 = tpu.matmul %37, %38, %cst_22 {dimension_numbers = #tpu.dot_dimension_numbers<[1], [0], [0], [1], [0, 0, 1, 1], [], []>} : vector<8x4xf32>, vector<4x1xf32>, vector<8x1xf32> -> vector<8x1xf32>
    %40 = vector.extract_strided_slice %0 {offsets = [3, 0], sizes = [1, 1], strides = [1, 1]} : vector<4x20xf32> to vector<1x1xf32>
    %41 = vector.broadcast %40 : vector<1x1xf32> to vector<8x1xf32>
    %42 = arith.addf %39, %41 : vector<8x1xf32>
    %cst_23 = arith.constant 5.000000e-01 : f32
    %43 = vector.broadcast %cst_23 : f32 to vector<8x1xf32>
    %44 = arith.mulf %43, %42 : vector<8x1xf32>
    %45 = math.tanh %44 : vector<8x1xf32>
    %cst_24 = arith.constant 5.000000e-01 : f32
    %46 = vector.broadcast %cst_24 : f32 to vector<8x1xf32>
    %47 = arith.mulf %46, %45 : vector<8x1xf32>
    %cst_25 = arith.constant 5.000000e-01 : f32
    %48 = vector.broadcast %cst_25 : f32 to vector<8x1xf32>
    %49 = arith.addf %47, %48 : vector<8x1xf32>
    %c0_26 = arith.constant 0 : index
    %c0_27 = arith.constant 0 : index
    %50 = vector.load %arg7[%c0_26, %c0_27] : memref<8x1xf32, #tpu.memory_space<vmem>>, vector<8x1xf32>
    tpu.vector_store %arg7[%c0_26, %c0_27], %49 {strides = array<i32>} : memref<8x1xf32, #tpu.memory_space<vmem>>, vector<8x1xf32>,
    return
  }
  func.func @transform_0(%arg0: i32) -> (i32, i32) {
    %c0_i32 = arith.constant 0 : i32
    %c0_i32_0 = arith.constant 0 : i32
    return %arg0, %c0_i32 : i32, i32
  }
  func.func @transform_1(%arg0: i32) -> (i32, i32) {
    %c0_i32 = arith.constant 0 : i32
    %c0_i32_0 = arith.constant 0 : i32
    %c0_i32_1 = arith.constant 0 : i32
    return %c0_i32, %c0_i32_0 : i32, i32
  }
  func.func @transform_2(%arg0: i32) -> (i32, i32) {
    %c0_i32 = arith.constant 0 : i32
    %c0_i32_0 = arith.constant 0 : i32
    %c0_i32_1 = arith.constant 0 : i32
    return %c0_i32, %c0_i32_0 : i32, i32
  }
  func.func @transform_3(%arg0: i32) -> (i32, i32) {
    %c0_i32 = arith.constant 0 : i32
    %c0_i32_0 = arith.constant 0 : i32
    %c0_i32_1 = arith.constant 0 : i32
    return %c0_i32, %c0_i32_0 : i32, i32
  }
  func.func @transform_4(%arg0: i32) -> (i32, i32) {
    %c0_i32 = arith.constant 0 : i32
    %c0_i32_0 = arith.constant 0 : i32
    %c0_i32_1 = arith.constant 0 : i32
    return %c0_i32, %c0_i32_0 : i32, i32
  }
  func.func @transform_5(%arg0: i32) -> (i32, i32) {
    %c0_i32 = arith.constant 0 : i32
    %c0_i32_0 = arith.constant 0 : i32
    %c0_i32_1 = arith.constant 0 : i32
    return %c0_i32, %c0_i32_0 : i32, i32
  }
  func.func @transform_6(%arg0: i32) -> (i32, i32) {
    %c0_i32 = arith.constant 0 : i32
    %c0_i32_0 = arith.constant 0 : i32
    return %arg0, %c0_i32 : i32, i32
  }
}

</mosaic_0001>

<bundles_post_ra>
// kernel: tpu_custom_call.1
= control target key start
LH: loop header
LB: loop body
LE: loop exit
PB: predicated region body
PF: predicated region fallthrough
CT: control target
= control target key end

     0   :  { %v645_v3 = vmov 0.0|0.0   ;;  %vm646_vm0 = vmmov 0   ;;  %v647_v8 = vmov 0.0   ;;  %vm73_vm1 = vcmask 1043456   ;;  %s851_s1 = inlined_call_operand.vmem [shape: f32[300,20], index: 1, kind: input, shape index: {}]   ;;  %s852_s0 = inlined_call_operand.vmem [shape: f32[8,300], index: 0, kind: input, shape index: {}]   ;;  %s853_s2 = inlined_call_operand.vmem [shape: f32[20,10], index: 2, kind: input, shape index: {}]   ;;  %s854_s5 = inlined_call_operand.vmem [shape: f32[4,20], index: 5, kind: input, shape index: {}]   ;;  %s855_s3 = inlined_call_operand.vmem [shape: f32[10,4], index: 3, kind: input, shape index: {}]   ;;  %s856_s4 = inlined_call_operand.vmem [shape: f32[4,1], index: 4, kind: input, shape index: {}]   ;;  %s857_s6 = inlined_call_operand.vmem [shape: f32[8,1], index: 6, kind: output, shape index: {}]  }
   0x1   :  { %v43_v0 = vld [vmem:[%s851_s1 + $0x80] sm:$0xff]  ;;  %v44_v1 = vld [vmem:[%s851_s1 + $0x88] sm:$0xff]  ;;  %616 = vmatprep.subr.bf16.mxu1 %v645_v3  ;;  %v45_v6 = vld [vmem:[%s851_s1 + $0x90] sm:$0xff]  ;;  %560 = vmatprep.mubr.msk.f32.mxu1 %vm646_vm0, %v647_v8  ;;  %vm648_vm2 = vmmov 1   ;;  %vm69_vm4 = vcmask 359424   ;;  %vm228_vm5 = vcmask 162816  }
   0x2   :  { %v27_v2 = vld [vmem:[%s851_s1] sm:$0xff]  ;;  %v584_v4 = vpack.c.bf16 %v44_v1, %v43_v0  ;;  %v28_v5 = vld [vmem:[%s851_s1 + $0x8] sm:$0xff]  ;;  %v46_v7 = vld [vmem:[%s851_s1 + $0x98] sm:$0xff]  ;;  %vm319_vm6 = vcmask 1041408   ;;  %vm315_vm8 = vcmask 80896   ;;  %vm402_vm9 = vcmask 31744  }
   0x3   :  { %v586_v9 = vpack.c.bf16 %v28_v5, %v27_v2  ;;  %v588_v10 = vpack.c.bf16 %v46_v7, %v45_v6  ;;  %v29_v11 = vld [vmem:[%s851_s1 + $0x10] sm:$0xff]  ;;  %v30_v12 = vld [vmem:[%s851_s1 + $0x18] sm:$0xff]  ;;  %v47_v13 = vld [vmem:[%s851_s1 + $0xa0] sm:$0xff]  ;;  %v65_v2 = vlaneseq  ;;  %vm483_vm10 = vcmask 7168  }
   0x4   :  { %585 = vmatprep.subr.bf16.mxu0 %v584_v4  ;;  %v48_v14 = vld [vmem:[%s851_s1 + $0xa8] sm:$0xff]  ;;  %v590_v15 = vpack.c.bf16 %v30_v12, %v29_v11  ;;  %v31_v17 = vld [vmem:[%s851_s1 + $0x20] sm:$0xff]  ;;  %v49_v19 = vld [vmem:[%s851_s1 + $0xb0] sm:$0xff] }
   0x5   :  { %587 = vmatpush3.bf16.msra.mxu0 %v586_v9  ;;  %v592_v16 = vpack.c.bf16 %v48_v14, %v47_v13  ;;  %v32_v18 = vld [vmem:[%s851_s1 + $0x28] sm:$0xff]  ;;  %v50_v20 = vld [vmem:[%s851_s1 + $0xb8] sm:$0xff]  ;;  %v33_v22 = vld [vmem:[%s851_s1 + $0x30] sm:$0xff]  ;;  %v66_v6 = vshrl.u32 %v65_v2, 7 }
   0x6   :  { %589 = vmatprep.subr.bf16.mxu0 %v588_v10  ;;  %v594_v21 = vpack.c.bf16 %v32_v18, %v31_v17  ;;  %v596_v23 = vpack.c.bf16 %v50_v20, %v49_v19  ;;  %v34_v24 = vld [vmem:[%s851_s1 + $0x38] sm:$0xff]  ;;  %v59_v25 = vld [vmem:[%s851_s1 + $0x100] sm:$0xff]  ;;  %v60_v26 = vld [vmem:[%s851_s1 + $0x108] sm:$0xff] }
   0x7   :  { %v51_v27 = vld [vmem:[%s851_s1 + $0xc0] sm:$0xff]  ;;  %v52_v28 = vld [vmem:[%s851_s1 + $0xc8] sm:$0xff]  ;;  %v617_v29 = vpack.c.bf16 %v60_v26, %v59_v25  ;;  %v61_v30 = vld [vmem:[%s851_s1 + $0x110] sm:$0xff]  ;;  %v598_v32 = vpack.c.bf16 %v34_v24, %v33_v22  ;;  %v67_v7 = vsub.s32 0, %v66_v6  ;;  %v226_v22 = vsub.s32 1, %v66_v6 }
   0x8   :  { %v62_v31 = vld [vmem:[%s851_s1 + $0x118] sm:$0xff]  ;;  %v35_v33 = vld [vmem:[%s851_s1 + $0x40] sm:$0xff]  ;;  %v25_v35 = vld [vmem:[%s852_s0 + $0x8] sm:$0xff]  ;;  %v600_v36 = vpack.c.bf16 %v52_v28, %v51_v27 }
   0x9   :  { %591 = vmatpush3.bf16.msra.mxu0 %v590_v15  ;;  %618 = vmatpush3.bf16.msra.mxu1 %v617_v29  ;;  %v620_v34 = vpack.c.bf16 %v62_v31, %v61_v30  ;;  %v36_v37 = vld [vmem:[%s851_s1 + $0x48] sm:$0xff]  ;;  %v63_v38 = vld [vmem:[%s851_s1 + $0x120] sm:$0xff]  ;;  %v53_v40 = vld [vmem:[%s851_s1 + $0xd0] sm:$0xff] }
   0xa   :  { %593 = vmatprep.subr.bf16.mxu0 %v592_v16  ;;  %619 = vmatprep.subr.bf16.mxu1 %v645_v3  ;;  %v64_v39 = vld [vmem:[%s851_s1 + $0x128] sm:$0xf]  ;;  %v54_v41 = vld [vmem:[%s851_s1 + $0xd8] sm:$0xff]  ;;  %v602_v42 = vpack.c.bf16 %v36_v37, %v35_v33  ;;  %v37_v45 = vld [vmem:[%s851_s1 + $0x50] sm:$0xff] }
   0xb   :  { %141 = vmatprep.mubr.f32.mxu0 %v25_v35  ;;  %v623_v43 = vpack.c.bf16 %v64_v39, %v63_v38  ;;  %v604_v44 = vpack.c.bf16 %v54_v41, %v53_v40  ;;  %v38_v46 = vld [vmem:[%s851_s1 + $0x58] sm:$0xff]  ;;  %vm624_vm3 = vmpackc.low %vm73_vm1, %vm648_vm2  ;;  %v55_v47 = vld [vmem:[%s851_s1 + $0xe0] sm:$0xff]  ;;  %v400_v41 = vsub.s32 3, %v66_v6 }
   0xc   :  { %v56_v48 = vld [vmem:[%s851_s1 + $0xe8] sm:$0xff]  ;;  %v606_v49 = vpack.c.bf16 %v38_v46, %v37_v45  ;;  %v26_v50 = vld [vmem:[%s852_s0 + $0x10] sm:$0xff]  ;;  %v39_v52 = vld [vmem:[%s851_s1 + $0x60] sm:$0xff] }
   0xd   :  { %595 = vmatpush3.bf16.msra.mxu0 %v594_v21  ;;  %621 = vmatpush3.bf16.msra.mxu1 %v620_v34  ;;  %v608_v51 = vpack.c.bf16 %v56_v48, %v55_v47  ;;  %v40_v53 = vld [vmem:[%s851_s1 + $0x68] sm:$0xff]  ;;  %v57_v54 = vld [vmem:[%s851_s1 + $0xf0] sm:$0xff]  ;;  %v58_v55 = vld [vmem:[%s851_s1 + $0xf8] sm:$0xff] }
   0xe   :  { %597 = vmatprep.subr.bf16.mxu0 %v596_v23  ;;  %622 = vmatprep.subr.bf16.mxu1 %v645_v3  ;;  %v610_v56 = vpack.c.bf16 %v40_v53, %v39_v52  ;;  %v612_v57 = vpack.c.bf16 %v58_v55, %v57_v54  ;;  %v41_v58 = vld [vmem:[%s851_s1 + $0x70] sm:$0xff]  ;;  %v42_v59 = vld [vmem:[%s851_s1 + $0x78] sm:$0xff]  ;;  %v24_v61 = vld [vmem:[%s852_s0] sm:$0xff] }
   0xf   :  { %v614_v60 = vpack.c.bf16 %v42_v59, %v41_v58  ;;  %v221_v62 = vld [vmem:[%s853_s2] sm:$0xff]  ;;  %v222_v63 = vld [vmem:[%s853_s2 + $0x8] sm:$0xff]  ;;  %v223_v1 = vld [vmem:[%s853_s2 + $0x10] sm:$0xf] }
  0x10   :  { %v627_v0 = vpack.c.bf16 %v222_v63, %v221_v62  ;;  %v23_v9 = vld [vmem:[%s854_s5] sm:$0xf]  ;;  %vm631_vm7 = vmpackc.low %vm319_vm6, %vm648_vm2  ;;  %v310_v20 = vld [vmem:[%s855_s3 + $0x8] sm:$0x3] }
  0x11   :  { %599 = vmatpush3.bf16.msra.mxu0 %v598_v32  ;;  %625 = vmatpush3.bf16.msk.msra.mxu1 %vm624_vm3, %v623_v43  ;;  %v68_v11 = vrot.slane %v23_v9, %v67_v7  ;;  %v309_v19 = vld [vmem:[%s855_s3] sm:$0xff]  ;;  %v227_v23 = vrot.slane %v23_v9, %v226_v22  ;;  %v313_v32 = vsub.s32 2, %v66_v6 }
  0x12   :  { %601 = vmatprep.subr.bf16.mxu0 %v600_v36  ;;  %626 = vmatprep.subr.bf16.mxu1 %v645_v3  ;;  %v630_v21 = vpack.c.bf16 %v310_v20, %v309_v19  ;;  %v397_v31 = vld [vmem:[%s856_s4] sm:$0xf] }
  0x13   :  { %v314_v33 = vrot.slane %v23_v9, %v313_v32 }
  0x14   :  { %561 = vmatmul.mubr.msk.f32.vlgmr.msra.gmra.mrb[0].mxu1 %vm69_vm4, %v26_v50 }
  0x15   :  { %603 = vmatpush3.bf16.msra.mxu0 %v602_v42  ;;  %569 = vmatprep.mubr.msk.f32.mxu1 %vm646_vm0, %v647_v8 }
  0x16   :  { %605 = vmatprep.subr.bf16.mxu0 %v604_v44  ;;  %628 = vmatpush3.bf16.msra.mxu1 %v627_v0 }
  0x17   :  { %567 = vmatprep.subr.mxu1 %v647_v8 }
  0x19   :  { %607 = vmatpush3.bf16.msra.mxu0 %v606_v49 }
  0x1a   :  { %609 = vmatprep.subr.bf16.mxu0 %v608_v51  ;;  %568 = vmatpush3.msk.msra.mxu1 %vm73_vm1, %v223_v1 }
  0x1b   :  { %629 = vmatprep.subr.bf16.mxu1 %v645_v3 }
  0x1d   :  { %611 = vmatpush3.bf16.msra.mxu0 %v610_v56 }
  0x1e   :  { %613 = vmatprep.subr.bf16.mxu0 %v612_v57 }
  0x21   :  { %615 = vmatpush3.bf16.msra.mxu0 %v614_v60 }
  0x24   :  { %142 = vmatmul.mubr.f32.vlgmr.msra.gmra.mrb[0].mxu0 %v24_v61 }
  0xe7   :  { %v213_v4 = vpop.f32.mrb[0].mxu1 }
  0xe8   :  { %v562_v5 = vpop.f32.mrb[1].mxu1 }
  0xf7   :  { %v529_v10 = vpop.f32.mrb[0].mxu0 }
  0xf8   :  { %v530_v12 = vpop.f32.mrb[1].mxu0 }
  0xf9   :  { %v531_v13 = vadd.f32 %v530_v12, %v529_v10 }
  0xfb   :  { %v144_v14 = vadd.f32 %v531_v13, %v68_v11 }
  0xfd   :  { %v214_v15 = vadd.f32 %v213_v4, %v144_v14 }
  0xff   :  { %v217_v16 = vmul.f32 0.5, %v214_v15 }
 0x101   :  { %637 = vtanh.f32 %v217_v16 }
 0x10b   :  { %v638_v17 = vpop.eup %637 }
 0x10c   :  { %v219_v18 = vmul.f32 0.5, %v638_v17 }
 0x10e   :  { %v220_v3 = vadd.f32 0.5, %v219_v18 }
 0x110   :  { %570 = vmatmul.mubr.msk.f32.vlgmr.msra.gmra.mrb[2].mxu1 %vm228_vm5, %v220_v3 }
 0x111   :  { %576 = vmatprep.mubr.msk.f32.mxu1 %vm646_vm0, %v647_v8  ;;  %632 = vmatpush3.bf16.msk.msra.mxu1 %vm631_vm7, %v630_v21 }
 0x112   :  { %579 = vmatprep.subr.mxu1 %v647_v8 }
 0x1e3   :  { %v301_v24 = vpop.f32.mrb[2].mxu1 }
 0x1e4   :  { %v302_v25 = vadd.f32 %v301_v24, %v227_v23  ;;  %v571_v26 = vpop.f32.mrb[3].mxu1 }
 0x1e6   :  { %v305_v27 = vmul.f32 0.5, %v302_v25 }
 0x1e8   :  { %639 = vtanh.f32 %v305_v27 }
 0x1f2   :  { %v640_v28 = vpop.eup %639 }
 0x1f3   :  { %v307_v29 = vmul.f32 0.5, %v640_v28 }
 0x1f5   :  { %v308_v30 = vadd.f32 0.5, %v307_v29 }
 0x1f7   :  { %577 = vmatmul.mubr.msk.f32.vlgmr.msra.gmra.mrb[4].mxu1 %vm315_vm8, %v308_v30 }
 0x1f8   :  { %581 = vmatprep.mubr.msk.f32.mxu1 %vm646_vm0, %v647_v8  ;;  %580 = vmatpush3.msk.msra.mxu1 %vm73_vm1, %v397_v31  ;;  %v401_v8 = vrot.slane %v23_v9, %v400_v41 }
 0x2ca   :  { %v389_v34 = vpop.f32.mrb[4].mxu1 }
 0x2cb   :  { %v390_v35 = vadd.f32 %v389_v34, %v314_v33  ;;  %v578_v36 = vpop.f32.mrb[5].mxu1 }
 0x2cd   :  { %v393_v37 = vmul.f32 0.5, %v390_v35 }
 0x2cf   :  { %641 = vtanh.f32 %v393_v37 }
 0x2d9   :  { %v642_v38 = vpop.eup %641 }
 0x2da   :  { %v395_v39 = vmul.f32 0.5, %v642_v38 }
 0x2dc   :  { %v396_v40 = vadd.f32 0.5, %v395_v39 }
 0x2de   :  { %582 = vmatmul.mubr.msk.f32.vlgmr.msra.gmra.mrb[6].mxu1 %vm402_vm9, %v396_v40 }
 0x3b1   :  { %v475_v42 = vpop.f32.mrb[6].mxu1 }
 0x3b2   :  { %v476_v43 = vadd.f32 %v475_v42, %v401_v8  ;;  %v583_v44 = vpop.f32.mrb[7].mxu1 }
 0x3b4   :  { %v479_v45 = vmul.f32 0.5, %v476_v43 }
 0x3b6   :  { %643 = vtanh.f32 %v479_v45 }
 0x3c0   :  { %v644_v46 = vpop.eup %643 }
 0x3c1   :  { %v481_v47 = vmul.f32 0.5, %v644_v46 }
 0x3c3   :  { %v482_v48 = vadd.f32 0.5, %v481_v47 }
 0x3c5   :  { %484 = vst.msk [vmem:[%s857_s6] sm:$0xff] %vm483_vm10, %v482_v48 }

</bundles_post_ra>
